<compile_context>
chip_gen: v7x
topology: tpu7x:2x2x1
jax: 0.10.0
libtpu: 0.0.40
codegen_flags: <defaults>
</compile_context>

<pallas_src>
import jax
import jax.numpy as jnp
from jax import lax
from jax.experimental import pallas as pl
from jax.experimental.pallas import tpu as pltpu


def flat_embedding_kernel(idx_ref, xnum_ref, tab_ref, out_ref):
    """idx_ref:[tb, n_cat] i32, xnum_ref:[tb, n_num] f32, tab_ref:[card, d],
    out_ref:[tb, n_cat*d + n_num] f32."""
    idx = idx_ref[...]                                   # [tb, n_cat]
    tab = tab_ref[...]                                   # [card, d]
    tb, n_cat = idx.shape
    card, d = tab.shape

    # One narrow [tb, card] compare per categorical feature; single cast to the
    # MXU dtype per feature (total elementwise work == one [tb, n_cat, card]
    # compare, with no lane-changing reshapes).  Stack feature-major along the
    # sublane axis so one compact matmul against the plain [card, d] table
    # covers every feature (no block-diagonal n_cat x blow-up).
    iota = lax.broadcasted_iota(jnp.int32, (tb, card), 1)
    onehots = [(iota == idx[:, j:j + 1]).astype(tab.dtype) for j in range(n_cat)]
    onehot = jnp.concatenate(onehots, axis=0)            # [n_cat*tb, card], j-major

    emb = jnp.dot(onehot, tab, preferred_element_type=jnp.float32)  # [n_cat*tb, d]

    # Scatter each feature's [tb, d] slab into its flattened column range.
    # (A single lane-dense slab store would require either a block-diagonal
    # table or a lane-merging reshape; the per-feature stores are VMEM-local
    # and tiny compared with the streamed I/O tiles.)
    for j in range(n_cat):
        out_ref[:, j * d:(j + 1) * d] = emb[j * tb:(j + 1) * tb, :].astype(out_ref.dtype)

    # Identity branch (x_num) fused into the same output tile: the final
    # concatenated output is produced exactly once, straight from the kernel.
    out_ref[:, n_cat * d:] = xnum_ref[...].astype(out_ref.dtype)


def flat_embedding(x_cat, table, x_num, *, tb=None):
    """FlatEmbedding(nn.Embedding(card, d), None).forward(x_cat, x_num)."""
    B, n_cat = x_cat.shape
    card, d = table.shape
    x_num = x_num.reshape(B, -1).astype(jnp.float32)
    n_num = x_num.shape[-1]
    assert n_num > 0, "Identity branch expected at least one numeric column"
    emb_width = n_cat * d
    out_width = emb_width + n_num
    tab_item = jnp.dtype(table.dtype).itemsize

    def working_set(tb_):
        dbl = 2 * tb_ * (n_cat * 4 + n_num * 4 + out_width * 4)  # double-buffered idx/xnum/out
        tab_b = card * d * tab_item                              # single-buffered resident table
        onehot_b = n_cat * tb_ * card * tab_item                 # stacked one-hot value
        emb_b = n_cat * tb_ * d * 4                              # f32 matmul staging
        return dbl + tab_b + onehot_b + emb_b

    # Chip-aware VMEM budget: v7x has 64 MiB physical VMEM vs 128 MiB on v5e/v6e.
    try:
        vmem_cap = pltpu.get_tpu_info().vmem_capacity_bytes
    except Exception:
        vmem_cap = 128 << 20
    budget = (40 << 20) if vmem_cap <= (64 << 20) else (96 << 20)

    if tb is None:
        if B <= 8:
            tb = B                                    # single full-dim block is legal
        else:
            # Aim for >= ~4 grid steps (megacore sharding on v7x + pipeline overlap),
            # sublane-aligned, shrunk until the working set fits the chip budget.
            tb = min(512, max(8, (pl.cdiv(B, 4) // 8) * 8))
            while tb > 8 and working_set(tb) > budget:
                tb -= 8
    grid = (pl.cdiv(B, tb),)

    vmem_limit = int(min(budget, max(16 << 20, int(1.25 * working_set(tb)))))

    out = pl.pallas_call(
        flat_embedding_kernel,
        out_shape=jax.ShapeDtypeStruct((B, out_width), jnp.float32),
        grid_spec=pltpu.PrefetchScalarGridSpec(
            num_scalar_prefetch=0,
            grid=grid,
            in_specs=[
                pl.BlockSpec((tb, n_cat), lambda i: (i, 0)),     # batch tile of indices
                pl.BlockSpec((tb, n_num), lambda i: (i, 0)),     # batch tile of numerics
                # Constant index_map -> table stays VMEM-resident; single-buffered
                # because it is never re-fetched (double-buffering = pure VMEM waste).
                pl.BlockSpec((card, d), lambda i: (0, 0),
                             pipeline_mode=pl.Buffered(1)),
            ],
            out_specs=pl.BlockSpec((tb, out_width), lambda i: (i, 0)),
        ),
        compiler_params=pltpu.CompilerParams(
            dimension_semantics=("parallel",),        # batch steps independent
            vmem_limit_bytes=vmem_limit,
        ),
    )(x_cat.astype(jnp.int32), x_num, table)
    return out


if __name__ == "__main__":
    # Small deterministic example shapes (B chosen so the grid has 4 steps).
    B, n_cat, card, emb_dim, n_num = 32, 4, 16, 8, 16

    key = jax.random.PRNGKey(0)
    k_tab, k_idx, k_num = jax.random.split(key, 3)

    # Deterministic synthetic "parameter" init and inputs.
    table = jax.random.normal(k_tab, (card, emb_dim), dtype=jnp.float32)
    x_cat = jax.random.randint(k_idx, (B, n_cat), 0, card, dtype=jnp.int32)
    x_num = jax.random.normal(k_num, (B, n_num), dtype=jnp.float32)

    out = jax.block_until_ready(flat_embedding(x_cat, table, x_num))

    # Pure-JAX reference of the PyTorch forward.
    ref = jnp.concatenate([table[x_cat].reshape(B, n_cat * emb_dim), x_num], axis=1)

    assert out.shape == (B, n_cat * emb_dim + n_num)
    assert jnp.allclose(out, ref, atol=1e-5, rtol=1e-5)
    print("KERNEL_OK")
</pallas_src>

<mosaic_0001>
module attributes {stable_mosaic.version = 11 : i64} {
  func.func @flat_embedding_kernel(%arg0: i32, %arg1: memref<8x4xi32, #tpu.memory_space<vmem>>, %arg2: memref<8x16xf32, #tpu.memory_space<vmem>>, %arg3: memref<16x8xf32, #tpu.memory_space<vmem>>, %arg4: memref<8x48xf32, #tpu.memory_space<vmem>>) attributes {dimension_semantics = [#tpu.dimension_semantics<parallel>], iteration_bounds = array<i64: 4>, scalar_prefetch = 0 : i64, scratch_operands = 0 : i64, tpu.core_type = #tpu.core_type<tc>, window_params = [{transform_indices = @transform_0, window_bounds = array<i64: 8, 4>}, {transform_indices = @transform_1, window_bounds = array<i64: 8, 16>}, {pipeline_mode = #tpu.pipeline_mode<synchronous>, transform_indices = @transform_2, window_bounds = array<i64: 16, 8>}, {transform_indices = @transform_3, window_bounds = array<i64: 8, 48>}]} {
    %c0 = arith.constant 0 : index
    %c0_0 = arith.constant 0 : index
    %0 = vector.load %arg1[%c0, %c0_0] : memref<8x4xi32, #tpu.memory_space<vmem>>, vector<8x4xi32>
    %c0_1 = arith.constant 0 : index
    %c0_2 = arith.constant 0 : index
    %1 = vector.load %arg3[%c0_1, %c0_2] : memref<16x8xf32, #tpu.memory_space<vmem>>, vector<16x8xf32>
    %2 = tpu.iota {dimensions = array<i32: 1>} : vector<8x16xi32>
    %3 = vector.extract_strided_slice %0 {offsets = [0, 0], sizes = [8, 1], strides = [1, 1]} : vector<8x4xi32> to vector<8x1xi32>
    %4 = vector.broadcast %3 : vector<8x1xi32> to vector<8x16xi32>
    %5 = arith.cmpi eq, %2, %4 : vector<8x16xi32>
    %6 = arith.extui %5 : vector<8x16xi1> to vector<8x16xi32>
    %7 = arith.sitofp %6 : vector<8x16xi32> to vector<8x16xf32>
    %8 = vector.extract_strided_slice %0 {offsets = [0, 1], sizes = [8, 1], strides = [1, 1]} : vector<8x4xi32> to vector<8x1xi32>
    %9 = vector.broadcast %8 : vector<8x1xi32> to vector<8x16xi32>
    %10 = arith.cmpi eq, %2, %9 : vector<8x16xi32>
    %11 = arith.extui %10 : vector<8x16xi1> to vector<8x16xi32>
    %12 = arith.sitofp %11 : vector<8x16xi32> to vector<8x16xf32>
    %13 = vector.extract_strided_slice %0 {offsets = [0, 2], sizes = [8, 1], strides = [1, 1]} : vector<8x4xi32> to vector<8x1xi32>
    %14 = vector.broadcast %13 : vector<8x1xi32> to vector<8x16xi32>
    %15 = arith.cmpi eq, %2, %14 : vector<8x16xi32>
    %16 = arith.extui %15 : vector<8x16xi1> to vector<8x16xi32>
    %17 = arith.sitofp %16 : vector<8x16xi32> to vector<8x16xf32>
    %18 = vector.extract_strided_slice %0 {offsets = [0, 3], sizes = [8, 1], strides = [1, 1]} : vector<8x4xi32> to vector<8x1xi32>
    %19 = vector.broadcast %18 : vector<8x1xi32> to vector<8x16xi32>
    %20 = arith.cmpi eq, %2, %19 : vector<8x16xi32>
    %21 = arith.extui %20 : vector<8x16xi1> to vector<8x16xi32>
    %22 = arith.sitofp %21 : vector<8x16xi32> to vector<8x16xf32>
    %23 = tpu.concatenate %7, %12, %17, %22 in 0 : vector<8x16xf32>, vector<8x16xf32>, vector<8x16xf32>, vector<8x16xf32> -> vector<32x16xf32>
    %cst = arith.constant dense<0.000000e+00> : vector<32x8xf32>
    %24 = tpu.matmul %23, %1, %cst {dimension_numbers = #tpu.dot_dimension_numbers<[1], [0], [0], [1], [0, 0, 1, 1], [], []>} : vector<32x16xf32>, vector<16x8xf32>, vector<32x8xf32> -> vector<32x8xf32>
    %25 = vector.extract_strided_slice %24 {offsets = [0, 0], sizes = [8, 8], strides = [1, 1]} : vector<32x8xf32> to vector<8x8xf32>
    %c0_3 = arith.constant 0 : index
    %c0_4 = arith.constant 0 : index
    %26 = vector.load %arg4[%c0_3, %c0_4] : memref<8x48xf32, #tpu.memory_space<vmem>>, vector<8x8xf32>
    tpu.vector_store %arg4[%c0_3, %c0_4], %25 {strides = array<i32>} : memref<8x48xf32, #tpu.memory_space<vmem>>, vector<8x8xf32>,
    %27 = vector.extract_strided_slice %24 {offsets = [8, 0], sizes = [8, 8], strides = [1, 1]} : vector<32x8xf32> to vector<8x8xf32>
    %c0_5 = arith.constant 0 : index
    %c8 = arith.constant 8 : index
    %28 = vector.load %arg4[%c0_5, %c8] : memref<8x48xf32, #tpu.memory_space<vmem>>, vector<8x8xf32>
    tpu.vector_store %arg4[%c0_5, %c8], %27 {strides = array<i32>} : memref<8x48xf32, #tpu.memory_space<vmem>>, vector<8x8xf32>,
    %29 = vector.extract_strided_slice %24 {offsets = [16, 0], sizes = [8, 8], strides = [1, 1]} : vector<32x8xf32> to vector<8x8xf32>
    %c0_6 = arith.constant 0 : index
    %c16 = arith.constant 16 : index
    %30 = vector.load %arg4[%c0_6, %c16] : memref<8x48xf32, #tpu.memory_space<vmem>>, vector<8x8xf32>
    tpu.vector_store %arg4[%c0_6, %c16], %29 {strides = array<i32>} : memref<8x48xf32, #tpu.memory_space<vmem>>, vector<8x8xf32>,
    %31 = vector.extract_strided_slice %24 {offsets = [24, 0], sizes = [8, 8], strides = [1, 1]} : vector<32x8xf32> to vector<8x8xf32>
    %c0_7 = arith.constant 0 : index
    %c24 = arith.constant 24 : index
    %32 = vector.load %arg4[%c0_7, %c24] : memref<8x48xf32, #tpu.memory_space<vmem>>, vector<8x8xf32>
    tpu.vector_store %arg4[%c0_7, %c24], %31 {strides = array<i32>} : memref<8x48xf32, #tpu.memory_space<vmem>>, vector<8x8xf32>,
    %c0_8 = arith.constant 0 : index
    %c0_9 = arith.constant 0 : index
    %33 = vector.load %arg2[%c0_8, %c0_9] : memref<8x16xf32, #tpu.memory_space<vmem>>, vector<8x16xf32>
    %c0_10 = arith.constant 0 : index
    %c32 = arith.constant 32 : index
    %34 = vector.load %arg4[%c0_10, %c32] : memref<8x48xf32, #tpu.memory_space<vmem>>, vector<8x16xf32>
    tpu.vector_store %arg4[%c0_10, %c32], %33 {strides = array<i32>} : memref<8x48xf32, #tpu.memory_space<vmem>>, vector<8x16xf32>,
    return
  }
  func.func @transform_0(%arg0: i32) -> (i32, i32) {
    %c0_i32 = arith.constant 0 : i32
    %c0_i32_0 = arith.constant 0 : i32
    return %arg0, %c0_i32 : i32, i32
  }
  func.func @transform_1(%arg0: i32) -> (i32, i32) {
    %c0_i32 = arith.constant 0 : i32
    %c0_i32_0 = arith.constant 0 : i32
    return %arg0, %c0_i32 : i32, i32
  }
  func.func @transform_2(%arg0: i32) -> (i32, i32) {
    %c0_i32 = arith.constant 0 : i32
    %c0_i32_0 = arith.constant 0 : i32
    %c0_i32_1 = arith.constant 0 : i32
    return %c0_i32, %c0_i32_0 : i32, i32
  }
  func.func @transform_3(%arg0: i32) -> (i32, i32) {
    %c0_i32 = arith.constant 0 : i32
    %c0_i32_0 = arith.constant 0 : i32
    return %arg0, %c0_i32 : i32, i32
  }
}

</mosaic_0001>

<bundles_post_ra>
// kernel: tpu_custom_call.1
= control target key start
LH: loop header
LB: loop body
LE: loop exit
PB: predicated region body
PF: predicated region fallthrough
CT: control target
= control target key end

     0   :  { %8 = vsyncpa [#allocation3], 0  ;;  %s730_s0 = inlined_call_operand.vmem [shape: s32[32,4], index: 0, kind: input, shape index: {}]   ;;  %s731_s1 = inlined_call_operand.vmem [shape: f32[32,16], index: 1, kind: input, shape index: {}]   ;;  %s732_s2 = inlined_call_operand.vmem [shape: f32[16,8], index: 2, kind: input, shape index: {}]   ;;  %s733_s3 = inlined_call_operand.hbm [shape: f32[32,48], index: 3, kind: output, shape index: {}]  }
   0x1   :  { %10 = vsyncpa [#allocation3 + $0x1], 0  ;;  %s610_s12 = smov 0   ;;  %s612_s13 = smov 0  }
   0x2   :  { %s614_s14 = smov 0   ;;  %s616_s15 = smov 0  }
   0x3 LB: > { %s631_s16 = sadd.s32 4294967295, %s578_s15   ;;  %s422_s17 = sadd.s32 4294967294, %s578_s15   ;;  %s578_s15 = sphi %s616_s15, %s739_s15   ;;  %s574_s14 = sphi %s614_s14, %s738_s14   ;;  %s570_s13 = sphi %s612_s13, %s737_s13   ;;  %s566_s12 = sphi %s610_s12, %s736_s12  }
   0x4   : > { %s635_s18 = sadd.s32 1, %s578_s15   ;;  %s96_s19 = sadd.s32 1, %s574_s14 }
   0x5   : > { %s93_s20 = ssub.s32 %s578_s15, %s635_s18  ;;  %p106_p0 = scmp.ne.s32.totalorder %s574_s14, %s570_s13 }
   0x6   : > { %p94_p1 = scmp.eq.s32.totalorder %s93_s20, 0  ;;  %p107_p2 = scmp.eq.s32.totalorder %s631_s16, 3 }
   0x7   : > { %p112_p3 = scmp.ne.s32.totalorder %s570_s13, %s566_s12  ;;  %p113_p4 = scmp.eq.s32.totalorder %s422_s17, 3 }
   0x8   : > { %s646_s21 = scalar_select %p94_p1, %s574_s14, %s96_s19  }
   0x9   : > { %p648_p5 = por %p107_p2, %p106_p0  ;;  %p652_p6 = por %p113_p4, %p112_p3 }
   0xa   : > { %p425_p7 = scmp.ge.s32.totalorder %s578_s15, 1  ;;  %p148_p8 = scmp.lt.s32.totalorder %s578_s15, 5 }
   0xc   : > { %p149_p9 = pnand %p425_p7, %p148_p8 }
   0xd   : > { %p175_p10 = scmp.lt.s32.totalorder (!%p149_p9), %s631_s16, 3  ;;  %v184_v0 = vld [vmem:[%s732_s2] sm:$0xff] (!%p149_p9)  ;;  %v580_v1 = vmov (!%p149_p9), 0   ;;  %v581_v2 = vmov (!%p149_p9), 1   ;;  %v185_v3 = vld [vmem:[%s732_s2 + $0x8] sm:$0xff] (!%p149_p9)  ;;  %v582_v6 = vmov (!%p149_p9), 2   ;;  %v186_v8 = vlaneseq (!%p149_p9) }
   0xe   : > { %152 = sbr.rel (%p149_p9) target bundleno = 508 (0x1fc), region = 32  ;;  %511 = vset.pattern.permute.xlu0 (!%p149_p9), %v580_v1  ;;  %513 = vset.pattern.permute.xlu1 (!%p149_p9), %v581_v2  ;;  %v457_v4 = vpack.c.bf16 (!%p149_p9), %v185_v3, %v184_v0  ;;  %v583_v7 = vmov (!%p149_p9), 3   ;;  %vm212_vm0 = vcmask (!%p149_p9), 130048   ;;  %v584_v12 = vmov (!%p149_p9), 0.0   ;;  %s172_s6 = sand.u32 (!%p149_p9), 1, %s570_s13  }
   0xf   : > { %v187_v9 = vand.u32 (!%p149_p9), 127, %v186_v8  ;;  %s426_s7 = sshll.u32 (!%p149_p9), %s172_s6, 3  ;;  %vm310_vm5 = vcmask (!%p149_p9), 64512   ;;  %s585_s8 = smov (!%p149_p9), 8   ;;  %vm316_vm6 = vcmask (!%p149_p9), 130112   ;;  %vm322_vm7 = vcmask (!%p149_p9), 195712  }
  0x10   : > { %458 = vmatprep.subr.bf16.mxu0 (!%p149_p9), %v457_v4  ;;  %461 = vmatprep.subr.bf16.mxu1 (!%p149_p9), %v457_v4  ;;  %s174_s9 = scalar_lea.vmem (!%p149_p9), [#allocation2], %s426_s7  ;;  %s586_s19 = smov (!%p149_p9), 24   ;;  %vm328_vm8 = vcmask (!%p149_p9), 261312   ;;  %vm335_vm9 = vcmask (!%p149_p9), 392448  }
  0x11   : > { %460 = vmatpush3.bf16.msra.mxu0 (!%p149_p9), %v457_v4  ;;  %462 = vmatpush3.bf16.msra.mxu1 (!%p149_p9), %v457_v4  ;;  %s587_s20 = smov (!%p149_p9), 16   ;;  %s588_s24 = smov (!%p149_p9), 32  }
  0x12   : > { %s438_s25 = sshll.u32 (!%p149_p9), %s631_s16, 7  ;;  %s351_s26 = sshll.u32 (!%p149_p9), %s174_s9, 4  ;;  %s688_s26 = int_to_ptr.vmem [resolvable:$true] %s351_s26 }
  0x13   : > { %s338_s30 = scalar_lea.sflag (!%p149_p9), [#allocation3], %s172_s6  ;;  %s589_s4 = smov (!%p149_p9), [#allocation2]  }
  0x15   : > { %s666_s28 = scalar_select %p175_p10, %s631_s16, 3 }
  0x16   : > { %s516_s16 = scalar_lea.vmem %s688_s26, 128 }
  0x17   : > { %s427_s29 = sshll.u32 %s666_s28, 3  ;;  %p517_p11 = scmp.ne.s32.totalorder %s688_s26, %s516_s16 }
  0x18   : > { %s178_s5 = scalar_lea.vmem %s730_s0, %s427_s29  ;;  %s182_s17 = scalar_lea.vmem %s731_s1, %s427_s29 }
  0x19   : > { %v183_v5 = vld [vmem:[%s178_s5] sm:$0xff]  ;;  %s686_s29 = scalar_lea.hbm %s733_s3, %s438_s25  ;;  %p518_p12 = pnand %p517_p11, %p648_p5 }
  0x1a   : > { %189 = vperm.xlu0 %511, %v183_v5   ;;  %195 = vperm.xlu1 %513, %v183_v5   ;;  %v330_v23 = vld [vmem:[%s182_s17] sm:$0xff]  ;;  %s520_s5 = sshll.u32 %s589_s4, 4  ;;  %s521_s5 = int_to_ptr.vmem [resolvable:$false] %s520_s5 }
  0x1b   : > { %p519_p13 = pneg %p518_p12  ;;  %s522_s7 = scalar_lea.vmem %s521_s5, 256 }
  0x1c   : > { %p523_p0 = scmp.lt.s32.totalorder %s688_s26, %s521_s5  ;;  %p524_p1 = scmp.lt.s32.totalorder %s522_s7, %s516_s16 }
  0x1e   : > { %512 = vset.pattern.permute.xlu0 %v582_v6  ;;  %514 = vset.pattern.permute.xlu1 %v583_v7  ;;  %p525_p2 = por %p524_p1, %p523_p0 }
  0x1f   : > { %201 = vperm.xlu0 %512, %v183_v5   ;;  %207 = vperm.xlu1 %514, %v183_v5  }
  0x20   : > { %p526_p3 = pnand %p525_p2, %p519_p13 }
  0x23   : > { %515 = vset.pattern.permute.xlu0 %v583_v7 }
  0x99   : > { %v190_v10 = vpop.permute.xlu0 %189  ;;  %v196_v11 = vpop.permute.xlu1 %195 }
  0x9a   : > { %vm191_vm1 = vcmp.eq.s32.totalorder %v187_v9, %v190_v10  ;;  %vm197_vm2 = vcmp.eq.s32.totalorder %v187_v9, %v196_v11 }
  0x9b   : > { %v430_v13 = vsel %vm197_vm2, 1.0, %v584_v12  ;;  %v429_v14 = vsel %vm191_vm1, 1.0, %v584_v12 }
  0x9c   : > { %451 = vmatprep.mubr.msk.f32.mxu0 %vm212_vm0, %v429_v14 }
  0x9d   : > { %452 = vmatmul.mubr.msk.f32.vlgmr.msra.gmra.mrb[0].mxu0 %vm212_vm0, %v430_v13 }
  0x9e   : > { %v202_v15 = vpop.permute.xlu0 %201  ;;  %v208_v16 = vpop.permute.xlu1 %207 }
  0x9f   : > { %vm203_vm3 = vcmp.eq.s32.totalorder %v187_v9, %v202_v15  ;;  %vm209_vm4 = vcmp.eq.s32.totalorder %v187_v9, %v208_v16 }
  0xa0   : > { %v432_v17 = vsel %vm209_vm4, 1.0, %v584_v12  ;;  %v431_v18 = vsel %vm203_vm3, 1.0, %v584_v12 }
  0xa1   : > { %454 = vmatprep.mubr.msk.f32.mxu1 %vm212_vm0, %v431_v18 }
  0xa2   : > { %455 = vmatmul.mubr.msk.f32.vlgmr.msra.gmra.mrb[0].mxu1 %vm212_vm0, %v432_v17 }
 0x170   : > { %v453_v19 = vpop.f32.mrb[0].mxu0 }
 0x171   : > { %313 = vrot.lane.b32.xlu1 %v453_v19, %s585_s8  ;;  %v291_v20 = vpop.f32.mrb[1].mxu0 }
 0x172   : > { %311 = vst.msk [vmem:[%s174_s9] sm:$0xff] %vm310_vm5, %v291_v20 }
 0x175   : > { %v456_v21 = vpop.f32.mrb[0].mxu1 }
 0x176   : > { %325 = vrot.lane.b32.xlu1 %v456_v21, %s586_s19  ;;  %v301_v22 = vpop.f32.mrb[1].mxu1 }
 0x177   : > { %319 = vrot.lane.b32.xlu0 %v301_v22, %s587_s20 }
 0x17b   : > { %332 = vrot.lane.b32.xlu0 %v330_v23, %s588_s24 }
 0x1e3   : > { %v314_v24 = vpop.permute.xlu1 %313 }
 0x1e4   : > { %317 = vst.msk [vmem:[%s174_s9] sm:$0xff] %vm316_vm6, %v314_v24 }
 0x1e8   : > { %v326_v26 = vpop.permute.xlu1 %325 }
 0x1e9   : > { %v320_v25 = vpop.permute.xlu0 %319 }
 0x1ea   : > { %323 = vst.msk [vmem:[%s174_s9] sm:$0xff] %vm322_vm7, %v320_v25 }
 0x1eb   : > { %329 = vst.msk [vmem:[%s174_s9] sm:$0xff] %vm328_vm8, %v326_v26 }
 0x1ed   : > { %v333_v27 = vpop.permute.xlu0 %332 }
 0x1ee   : > { %336 = vst.msk [vmem:[%s174_s9] sm:$0xff] %vm335_vm9, %v333_v27 }
 0x1ef   : > { %529 = shalt.err (!%p526_p3)
}
 0x1f0   : > { %s530_s6 = scalar_lea.hbm %s686_s29, 128  ;;  %s534_s10 = scalar_lea.hbm %s733_s3, 512 }
 0x1f1   : > { %p531_p4 = scmp.ne.s32.totalorder %s686_s29, %s530_s6  ;;  %p535_p9 = scmp.lt.u32.totalorder %s686_s29, %s733_s3 }
 0x1f2   : > { %p536_p10 = scmp.lt.u32.totalorder %s534_s10, %s530_s6  ;;  %p538_p12 = scmp.lt.u32.totalorder %s530_s6, %s686_s29 }
 0x1f3   : > { %p532_p7 = pnand %p531_p4, %p648_p5 }
 0x1f4   : > { %p537_p11 = por %p536_p10, %p535_p9 }
 0x1f5   : > { %p533_p8 = pneg %p532_p7 }
 0x1f6   : > { %p539_p13 = por %p538_p12, %p537_p11 }
 0x1f8   : > { %p540_p0 = pnand %p539_p13, %p533_p8 }
 0x1fa   : > { %543 = shalt.err (!%p540_p0)
}
 0x1fb   : > { %463 = dma.vmem_to_hbm [thread:$0]  (%p648_p5), %s688_s26, 128, %s686_s29, %s338_s30  }
 0x1fc PF: > { %p469_p1 = scmp.ge.s32.totalorder %s578_s15, 2  ;;  %s363_s19 = sand.u32 1, %s566_s12  }
 0x1fd   : > { %s364_s20 = scalar_lea.sflag [#allocation3], %s363_s19 }
 0x1fe   : > { %p466_p2 = pnand %p469_p1, %p652_p6 }
 0x200   : > { %561 = dma.done.wait (!%p466_p2), %s364_s20, 128  }
 0x201   : > { %563 = vsyncadd (!%p466_p2), %s364_s20, 4294967168  ;;  %p13_p3 = scmp.ge.s32.totalorder %s635_s18, 6   ;;  %s736_s12 = smov %s570_s13 }
 0x202   : > { %s737_s13 = smov %s574_s14  ;;  %s738_s14 = smov %s646_s21 }
 0x203   : > { %s739_s15 = smov %s635_s18  ;;  %15 = sbr.rel (!%p13_p3) target bundleno = 3 (0x3), region = 70 }
 0x20a   :  { %369 = vsyncpa [#allocation3], 1 }
 0x20b   :  { %371 = vsyncpa [#allocation3 + $0x1], 1 }

</bundles_post_ra>
